<compile_context>
chip_gen: v5e
topology: v5e:2x2
jax: 0.10.0
libtpu: 0.0.40
codegen_flags: <defaults>
</compile_context>

<pallas_src>
import functools

import numpy as np
import jax
import jax.numpy as jnp
from jax import lax
from jax.experimental import pallas as pl
from jax.experimental.pallas import tpu as pltpu


def _ccirc_kernel(x_ref, w_ref, b_ref, o_ref, *, H, W, kH, kW):
    """Circular correlation with the (flipped) ConvTranspose2d kernel for one image block.

    x_ref: (bn*Cin, H*W)          bn images, channels stacked on sublanes, spatial on lanes
    w_ref: (bn*Cout, kH*kW*bn*Cin) block-diagonal flipped weight; tap t lives in columns
                                   [t*bn*Cin, (t+1)*bn*Cin) with (image, channel) row order
    b_ref: (bn*Cout, 1)            bias, tiled per image
    o_ref: (bn*Cout, H*W)          output slab (already "cropped": same spatial size as x)
    """
    HW = H * W
    R = x_ref.shape[0]                          # bn * Cin rows in this block
    ph, pw = (kH - 1) // 2, (kW - 1) // 2

    x = x_ref[...]                                              # (R, HW)
    # lane index -> column within an image row (for the W-wraparound fixup)
    col = lax.broadcasted_iota(jnp.int32, (R, HW), 1) % W

    acc = None
    t = 0
    for kh in range(kH):
        dh = (kh - ph) % H                      # circular row shift
        for kw in range(kW):
            dw = (kw - pw) % W                  # circular column shift
            a = (dh * W + dw) % HW
            # tap[r, p] = x[r, (p + a) mod HW]  where the column does not wrap
            base = pltpu.roll(x, shift=(HW - a) % HW, axis=1) if a else x
            if dw == 0:
                tap = base
            else:
                a2 = (dh * W + dw - W) % HW     # flat offset where the column wraps
                alt = pltpu.roll(x, shift=(HW - a2) % HW, axis=1)
                tap = jnp.where(col < (W - dw), base, alt)
            # Block-diagonal weight slice for this tap: zeros remove cross-image terms,
            # so one MXU dot covers every image in the block at once.
            w_t = w_ref[:, t * R:(t + 1) * R]                   # (bn*Cout, R)
            part = lax.dot_general(
                w_t, tap,
                dimension_numbers=(((1,), (0,)), ((), ())),
                preferred_element_type=jnp.float32)             # (bn*Cout, HW)
            acc = part if acc is None else acc + part
            t += 1

    o_ref[...] = acc + b_ref[...]               # single full-width, lane-dense store


def _pick_block_images(n_images, cin, cout):
    """Images per grid step.  Fewest grid steps wins (the kernel is per-step-overhead
    bound at these shapes); a split is only used when every block row count stays a
    multiple of 8 sublanes and the per-step input stays modest."""
    best = None
    for bn in range(1, n_images + 1):
        if n_images % bn:
            continue
        if bn * cin <= 32 and (bn * cin) % 8 == 0 and (bn * cout) % 8 == 0:
            best = bn
    if best is not None:
        return best
    return n_images  # single step: blocks equal the full arrays -> always a legal BlockSpec


@functools.partial(jax.jit, static_argnames=("kernel_size", "stride"))
def circular_conv_transpose2d(x, weight, bias, kernel_size, stride):
    """Forward pass matching the PyTorch CircularConvTranspose2d module (NCHW in/out).

    x:      (N, Cin, H, W)  float32
    weight: (Cin, Cout, kH, kW)  (PyTorch ConvTranspose2d weight layout)
    bias:   (Cout,)
    """
    if isinstance(kernel_size, int):
        kernel_size = (kernel_size, kernel_size)
    if isinstance(stride, int):
        stride = (stride, stride)
    kH, kW = kernel_size
    sH, sW = stride
    pad_h = int(0.5 + (kH - 1.0) / (2.0 * sH))
    pad_w = int(0.5 + (kW - 1.0) / (2.0 * sW))

    N, Cin, H, W = x.shape
    Cout = weight.shape[1]

    if sH == 1 and sW == 1 and kH % 2 == 1 and kW % 2 == 1:
        # Fast path: circular-pad -> ConvT(stride=1, pad=0) -> crop  ==  circular
        # correlation with the flipped kernel; output spatial size == input spatial size.
        HW = H * W
        T = kH * kW
        bn = _pick_block_images(N, Cin, Cout)
        grid = (N // bn,)

        x2 = x.reshape(N * Cin, HW).astype(jnp.float32)          # free contiguous reshape

        # (Cin, Cout, kH, kW) -> spatial flip -> (Cout, T, Cin), then expand to a
        # block-diagonal (bn*Cout, T*bn*Cin) matrix so one contraction handles bn images.
        w_r = jnp.transpose(weight[:, :, ::-1, ::-1], (1, 2, 3, 0))
        w_r = w_r.reshape(Cout, T, Cin).astype(jnp.float32)
        eye = jnp.eye(bn, dtype=jnp.float32)
        # w_big[n*Cout+oc, (t*bn + m)*Cin + ci] = eye[n, m] * w_r[oc, t, ci]
        w_big = (eye[:, None, None, :, None] * w_r[None, :, :, None, :])
        w_big = w_big.reshape(bn * Cout, T * bn * Cin)
        b_big = jnp.tile(bias.astype(jnp.float32), bn).reshape(bn * Cout, 1)

        kernel = functools.partial(_ccirc_kernel, H=H, W=W, kH=kH, kW=kW)
        out2 = pl.pallas_call(
            kernel,
            out_shape=jax.ShapeDtypeStruct((N * Cout, HW), jnp.float32),
            grid=grid,
            in_specs=[
                pl.BlockSpec((bn * Cin, HW), lambda i: (i, 0)),
                pl.BlockSpec((bn * Cout, T * bn * Cin), lambda i: (0, 0)),
                pl.BlockSpec((bn * Cout, 1), lambda i: (0, 0)),
            ],
            out_specs=pl.BlockSpec((bn * Cout, HW), lambda i: (i, 0)),
            compiler_params=pltpu.CompilerParams(
                dimension_semantics=("parallel",)),              # only matters when >1 step (v7x)
            cost_estimate=pl.CostEstimate(
                flops=2 * N * Cout * HW * kH * kW * Cin,
                transcendentals=0,
                bytes_accessed=4 * (N * Cin * HW + bn * Cout * T * bn * Cin
                                    + bn * Cout + N * Cout * HW)),
        )(x2, w_big, b_big)
        return out2.reshape(N, Cout, H, W)                       # free contiguous reshape

    # TODO(synk): stride>1 / even-kernel general path is plain JAX (lhs-dilated conv),
    # not a Pallas kernel; a phase-decomposed Pallas path would go here.
    xp = jnp.pad(x, ((0, 0), (0, 0), (pad_h, pad_h), (pad_w, pad_w)), mode="wrap")
    w_oihw = jnp.transpose(weight[:, :, ::-1, ::-1], (1, 0, 2, 3))
    full = lax.conv_general_dilated(
        xp.astype(jnp.float32), w_oihw.astype(jnp.float32),
        window_strides=(1, 1),
        padding=((kH - 1, kH - 1), (kW - 1, kW - 1)),
        lhs_dilation=(sH, sW),
        dimension_numbers=("NCHW", "OIHW", "NCHW"),
        precision=lax.Precision.HIGHEST)
    full = full + bias[None, :, None, None]
    ch, cw = (sH + 1) * pad_h, (sW + 1) * pad_w
    return full[:, :, ch:full.shape[2] - ch, cw:full.shape[3] - cw]


def _reference_numpy(x, weight, bias, kernel_size, stride):
    """Naive NumPy reference of circular-pad -> ConvTranspose2d -> crop."""
    kH, kW = kernel_size
    sH, sW = stride
    pad_h = int(0.5 + (kH - 1.0) / (2.0 * sH))
    pad_w = int(0.5 + (kW - 1.0) / (2.0 * sW))
    x = np.asarray(x, np.float32)
    weight = np.asarray(weight, np.float32)
    bias = np.asarray(bias, np.float32)

    xp = np.pad(x, ((0, 0), (0, 0), (pad_h, pad_h), (pad_w, pad_w)), mode="wrap")
    N, Cin, Hp, Wp = xp.shape
    Cout = weight.shape[1]
    Ho = (Hp - 1) * sH + kH
    Wo = (Wp - 1) * sW + kW
    out = np.zeros((N, Cout, Ho, Wo), np.float32)
    for n in range(N):
        for ic in range(Cin):
            for oc in range(Cout):
                for ih in range(Hp):
                    for iw in range(Wp):
                        out[n, oc, ih * sH:ih * sH + kH, iw * sW:iw * sW + kW] += (
                            xp[n, ic, ih, iw] * weight[ic, oc]
                        )
    out += bias[None, :, None, None]
    crop_h = (sH + 1) * pad_h
    crop_w = (sW + 1) * pad_w
    return out[:, :, crop_h:Ho - crop_h, crop_w:Wo - crop_w]


if __name__ == "__main__":
    # module config: CircularConvTranspose2d(in_channels=4, out_channels=4,
    #                                        kernel_size=3, stride=1, padding=1)
    in_channels, out_channels = 4, 4
    kernel_size = (3, 3)
    stride = (1, 1)

    key = jax.random.PRNGKey(0)
    kx, kwt, kb = jax.random.split(key, 3)

    # input: NCHW, batch=2, channels=4, spatial=16x16
    x = jax.random.normal(kx, (2, in_channels, 16, 16), dtype=jnp.float32)
    fan = in_channels * kernel_size[0] * kernel_size[1]
    bound = 1.0 / np.sqrt(fan)
    weight = jax.random.uniform(
        kwt, (in_channels, out_channels, kernel_size[0], kernel_size[1]),
        dtype=jnp.float32, minval=-bound, maxval=bound)
    bias = jax.random.uniform(
        kb, (out_channels,), dtype=jnp.float32, minval=-bound, maxval=bound)

    # Pallas fast path (stride=1, odd kernel) vs naive NumPy reference.
    out = circular_conv_transpose2d(x, weight, bias,
                                    kernel_size=kernel_size, stride=stride)
    out = jax.block_until_ready(out)
    ref = _reference_numpy(x, weight, bias, kernel_size, stride)
    assert out.shape == ref.shape, (out.shape, ref.shape)
    np.testing.assert_allclose(np.asarray(out), ref, rtol=1e-4, atol=1e-4)

    # stride=2 sanity check of the (non-Pallas) general fallback path (review concern).
    out_s2 = circular_conv_transpose2d(x, weight, bias,
                                       kernel_size=kernel_size, stride=(2, 2))
    out_s2 = jax.block_until_ready(out_s2)
    ref_s2 = _reference_numpy(x, weight, bias, kernel_size, (2, 2))
    assert out_s2.shape == ref_s2.shape, (out_s2.shape, ref_s2.shape)
    np.testing.assert_allclose(np.asarray(out_s2), ref_s2, rtol=1e-4, atol=1e-4)

    print("KERNEL_OK")
</pallas_src>

<mosaic_0001>
module attributes {stable_mosaic.version = 11 : i64} {
  func.func @_ccirc_kernel(%arg0: i32, %arg1: memref<8x256xf32, #tpu.memory_space<vmem>>, %arg2: memref<8x72xf32, #tpu.memory_space<vmem>>, %arg3: memref<8x1xf32, #tpu.memory_space<vmem>>, %arg4: memref<8x256xf32, #tpu.memory_space<vmem>>) attributes {dimension_semantics = [#tpu.dimension_semantics<parallel>], iteration_bounds = array<i64: 1>, scalar_prefetch = 0 : i64, scratch_operands = 0 : i64, tpu.core_type = #tpu.core_type<tc>, window_params = [{transform_indices = @transform_0, window_bounds = array<i64: 8, 256>}, {pipeline_mode = #tpu.pipeline_mode<synchronous>, transform_indices = @transform_1, window_bounds = array<i64: 8, 72>}, {pipeline_mode = #tpu.pipeline_mode<synchronous>, transform_indices = @transform_2, window_bounds = array<i64: 8, 1>}, {transform_indices = @transform_3, window_bounds = array<i64: 8, 256>}]} {
    %c0 = arith.constant 0 : index
    %c0_0 = arith.constant 0 : index
    %0 = vector.load %arg1[%c0, %c0_0] : memref<8x256xf32, #tpu.memory_space<vmem>>, vector<8x256xf32>
    %1 = tpu.iota {dimensions = array<i32: 1>} : vector<8x256xi32>
    %c16_i32 = arith.constant 16 : i32
    %c0_i32 = arith.constant 0 : i32
    %2 = arith.cmpi eq, %c16_i32, %c0_i32 : i32
    %c1_i32 = arith.constant 1 : i32
    %3 = arith.select %2, %c1_i32, %c16_i32 : i32
    %4 = vector.broadcast %3 : i32 to vector<8x256xi32>
    %5 = arith.remsi %1, %4 : vector<8x256xi32>
    %c0_i32_1 = arith.constant 0 : i32
    %6 = vector.broadcast %c0_i32_1 : i32 to vector<8x256xi32>
    %7 = arith.cmpi ne, %5, %6 : vector<8x256xi32>
    %c0_i32_2 = arith.constant 0 : i32
    %8 = vector.broadcast %c0_i32_2 : i32 to vector<8x256xi32>
    %9 = arith.cmpi slt, %5, %8 : vector<8x256xi32>
    %c0_i32_3 = arith.constant 0 : i32
    %10 = arith.cmpi slt, %3, %c0_i32_3 : i32
    %11 = vector.broadcast %10 : i1 to vector<8x256xi1>
    %12 = vector.broadcast %11 : vector<8x256xi1> to vector<8x256xi1>
    %13 = arith.xori %9, %12 : vector<8x256xi1>
    %14 = arith.andi %13, %7 : vector<8x256xi1>
    %15 = vector.broadcast %3 : i32 to vector<8x256xi32>
    %16 = arith.addi %5, %15 : vector<8x256xi32>
    %17 = arith.select %14, %16, %5 : vector<8x256xi1>, vector<8x256xi32>
    %c1_i32_4 = arith.constant 1 : i32
    %18 = tpu.dynamic_rotate %0 by %c1_i32_4 dim 1 : vector<8x256xf32>, i32 -> vector<8x256xf32>
    %c17_i32 = arith.constant 17 : i32
    %19 = tpu.dynamic_rotate %0 by %c17_i32 dim 1 : vector<8x256xf32>, i32 -> vector<8x256xf32>
    %c1_i32_5 = arith.constant 1 : i32
    %20 = vector.broadcast %c1_i32_5 : i32 to vector<8x256xi32>
    %21 = arith.cmpi slt, %17, %20 : vector<8x256xi32>
    %22 = arith.select %21, %18, %19 : vector<8x256xi1>, vector<8x256xf32>
    %c0_6 = arith.constant 0 : index
    %c0_7 = arith.constant 0 : index
    %23 = vector.load %arg2[%c0_6, %c0_7] : memref<8x72xf32, #tpu.memory_space<vmem>>, vector<8x8xf32>
    %cst = arith.constant dense<0.000000e+00> : vector<8x256xf32>
    %24 = tpu.matmul %23, %22, %cst {dimension_numbers = #tpu.dot_dimension_numbers<[1], [0], [0], [1], [0, 0, 1, 1], [], []>} : vector<8x8xf32>, vector<8x256xf32>, vector<8x256xf32> -> vector<8x256xf32>
    %c16_i32_8 = arith.constant 16 : i32
    %25 = tpu.dynamic_rotate %0 by %c16_i32_8 dim 1 : vector<8x256xf32>, i32 -> vector<8x256xf32>
    %c0_9 = arith.constant 0 : index
    %c8 = arith.constant 8 : index
    %26 = vector.load %arg2[%c0_9, %c8] : memref<8x72xf32, #tpu.memory_space<vmem>>, vector<8x8xf32>
    %cst_10 = arith.constant dense<0.000000e+00> : vector<8x256xf32>
    %27 = tpu.matmul %26, %25, %cst_10 {dimension_numbers = #tpu.dot_dimension_numbers<[1], [0], [0], [1], [0, 0, 1, 1], [], []>} : vector<8x8xf32>, vector<8x256xf32>, vector<8x256xf32> -> vector<8x256xf32>
    %28 = arith.addf %24, %27 : vector<8x256xf32>
    %c15_i32 = arith.constant 15 : i32
    %29 = tpu.dynamic_rotate %0 by %c15_i32 dim 1 : vector<8x256xf32>, i32 -> vector<8x256xf32>
    %c31_i32 = arith.constant 31 : i32
    %30 = tpu.dynamic_rotate %0 by %c31_i32 dim 1 : vector<8x256xf32>, i32 -> vector<8x256xf32>
    %c15_i32_11 = arith.constant 15 : i32
    %31 = vector.broadcast %c15_i32_11 : i32 to vector<8x256xi32>
    %32 = arith.cmpi slt, %17, %31 : vector<8x256xi32>
    %33 = arith.select %32, %29, %30 : vector<8x256xi1>, vector<8x256xf32>
    %c0_12 = arith.constant 0 : index
    %c16 = arith.constant 16 : index
    %34 = vector.load %arg2[%c0_12, %c16] : memref<8x72xf32, #tpu.memory_space<vmem>>, vector<8x8xf32>
    %cst_13 = arith.constant dense<0.000000e+00> : vector<8x256xf32>
    %35 = tpu.matmul %34, %33, %cst_13 {dimension_numbers = #tpu.dot_dimension_numbers<[1], [0], [0], [1], [0, 0, 1, 1], [], []>} : vector<8x8xf32>, vector<8x256xf32>, vector<8x256xf32> -> vector<8x256xf32>
    %36 = arith.addf %28, %35 : vector<8x256xf32>
    %c241_i32 = arith.constant 241 : i32
    %37 = tpu.dynamic_rotate %0 by %c241_i32 dim 1 : vector<8x256xf32>, i32 -> vector<8x256xf32>
    %c1_i32_14 = arith.constant 1 : i32
    %38 = tpu.dynamic_rotate %0 by %c1_i32_14 dim 1 : vector<8x256xf32>, i32 -> vector<8x256xf32>
    %c1_i32_15 = arith.constant 1 : i32
    %39 = vector.broadcast %c1_i32_15 : i32 to vector<8x256xi32>
    %40 = arith.cmpi slt, %17, %39 : vector<8x256xi32>
    %41 = arith.select %40, %37, %38 : vector<8x256xi1>, vector<8x256xf32>
    %c0_16 = arith.constant 0 : index
    %c24 = arith.constant 24 : index
    %42 = vector.load %arg2[%c0_16, %c24] : memref<8x72xf32, #tpu.memory_space<vmem>>, vector<8x8xf32>
    %cst_17 = arith.constant dense<0.000000e+00> : vector<8x256xf32>
    %43 = tpu.matmul %42, %41, %cst_17 {dimension_numbers = #tpu.dot_dimension_numbers<[1], [0], [0], [1], [0, 0, 1, 1], [], []>} : vector<8x8xf32>, vector<8x256xf32>, vector<8x256xf32> -> vector<8x256xf32>
    %44 = arith.addf %36, %43 : vector<8x256xf32>
    %c0_18 = arith.constant 0 : index
    %c32 = arith.constant 32 : index
    %45 = vector.load %arg2[%c0_18, %c32] : memref<8x72xf32, #tpu.memory_space<vmem>>, vector<8x8xf32>
    %cst_19 = arith.constant dense<0.000000e+00> : vector<8x256xf32>
    %46 = tpu.matmul %45, %0, %cst_19 {dimension_numbers = #tpu.dot_dimension_numbers<[1], [0], [0], [1], [0, 0, 1, 1], [], []>} : vector<8x8xf32>, vector<8x256xf32>, vector<8x256xf32> -> vector<8x256xf32>
    %47 = arith.addf %44, %46 : vector<8x256xf32>
    %c255_i32 = arith.constant 255 : i32
    %48 = tpu.dynamic_rotate %0 by %c255_i32 dim 1 : vector<8x256xf32>, i32 -> vector<8x256xf32>
    %c15_i32_20 = arith.constant 15 : i32
    %49 = tpu.dynamic_rotate %0 by %c15_i32_20 dim 1 : vector<8x256xf32>, i32 -> vector<8x256xf32>
    %c15_i32_21 = arith.constant 15 : i32
    %50 = vector.broadcast %c15_i32_21 : i32 to vector<8x256xi32>
    %51 = arith.cmpi slt, %17, %50 : vector<8x256xi32>
    %52 = arith.select %51, %48, %49 : vector<8x256xi1>, vector<8x256xf32>
    %c0_22 = arith.constant 0 : index
    %c40 = arith.constant 40 : index
    %53 = vector.load %arg2[%c0_22, %c40] : memref<8x72xf32, #tpu.memory_space<vmem>>, vector<8x8xf32>
    %cst_23 = arith.constant dense<0.000000e+00> : vector<8x256xf32>
    %54 = tpu.matmul %53, %52, %cst_23 {dimension_numbers = #tpu.dot_dimension_numbers<[1], [0], [0], [1], [0, 0, 1, 1], [], []>} : vector<8x8xf32>, vector<8x256xf32>, vector<8x256xf32> -> vector<8x256xf32>
    %55 = arith.addf %47, %54 : vector<8x256xf32>
    %c225_i32 = arith.constant 225 : i32
    %56 = tpu.dynamic_rotate %0 by %c225_i32 dim 1 : vector<8x256xf32>, i32 -> vector<8x256xf32>
    %c241_i32_24 = arith.constant 241 : i32
    %57 = tpu.dynamic_rotate %0 by %c241_i32_24 dim 1 : vector<8x256xf32>, i32 -> vector<8x256xf32>
    %c1_i32_25 = arith.constant 1 : i32
    %58 = vector.broadcast %c1_i32_25 : i32 to vector<8x256xi32>
    %59 = arith.cmpi slt, %17, %58 : vector<8x256xi32>
    %60 = arith.select %59, %56, %57 : vector<8x256xi1>, vector<8x256xf32>
    %c0_26 = arith.constant 0 : index
    %c48 = arith.constant 48 : index
    %61 = vector.load %arg2[%c0_26, %c48] : memref<8x72xf32, #tpu.memory_space<vmem>>, vector<8x8xf32>
    %cst_27 = arith.constant dense<0.000000e+00> : vector<8x256xf32>
    %62 = tpu.matmul %61, %60, %cst_27 {dimension_numbers = #tpu.dot_dimension_numbers<[1], [0], [0], [1], [0, 0, 1, 1], [], []>} : vector<8x8xf32>, vector<8x256xf32>, vector<8x256xf32> -> vector<8x256xf32>
    %63 = arith.addf %55, %62 : vector<8x256xf32>
    %c240_i32 = arith.constant 240 : i32
    %64 = tpu.dynamic_rotate %0 by %c240_i32 dim 1 : vector<8x256xf32>, i32 -> vector<8x256xf32>
    %c0_28 = arith.constant 0 : index
    %c56 = arith.constant 56 : index
    %65 = vector.load %arg2[%c0_28, %c56] : memref<8x72xf32, #tpu.memory_space<vmem>>, vector<8x8xf32>
    %cst_29 = arith.constant dense<0.000000e+00> : vector<8x256xf32>
    %66 = tpu.matmul %65, %64, %cst_29 {dimension_numbers = #tpu.dot_dimension_numbers<[1], [0], [0], [1], [0, 0, 1, 1], [], []>} : vector<8x8xf32>, vector<8x256xf32>, vector<8x256xf32> -> vector<8x256xf32>
    %67 = arith.addf %63, %66 : vector<8x256xf32>
    %c239_i32 = arith.constant 239 : i32
    %68 = tpu.dynamic_rotate %0 by %c239_i32 dim 1 : vector<8x256xf32>, i32 -> vector<8x256xf32>
    %c255_i32_30 = arith.constant 255 : i32
    %69 = tpu.dynamic_rotate %0 by %c255_i32_30 dim 1 : vector<8x256xf32>, i32 -> vector<8x256xf32>
    %c15_i32_31 = arith.constant 15 : i32
    %70 = vector.broadcast %c15_i32_31 : i32 to vector<8x256xi32>
    %71 = arith.cmpi slt, %17, %70 : vector<8x256xi32>
    %72 = arith.select %71, %68, %69 : vector<8x256xi1>, vector<8x256xf32>
    %c0_32 = arith.constant 0 : index
    %c64 = arith.constant 64 : index
    %73 = vector.load %arg2[%c0_32, %c64] : memref<8x72xf32, #tpu.memory_space<vmem>>, vector<8x8xf32>
    %cst_33 = arith.constant dense<0.000000e+00> : vector<8x256xf32>
    %74 = tpu.matmul %73, %72, %cst_33 {dimension_numbers = #tpu.dot_dimension_numbers<[1], [0], [0], [1], [0, 0, 1, 1], [], []>} : vector<8x8xf32>, vector<8x256xf32>, vector<8x256xf32> -> vector<8x256xf32>
    %75 = arith.addf %67, %74 : vector<8x256xf32>
    %c0_34 = arith.constant 0 : index
    %c0_35 = arith.constant 0 : index
    %76 = vector.load %arg3[%c0_34, %c0_35] : memref<8x1xf32, #tpu.memory_space<vmem>>, vector<8x1xf32>
    %77 = vector.broadcast %76 : vector<8x1xf32> to vector<8x256xf32>
    %78 = arith.addf %75, %77 : vector<8x256xf32>
    %c0_36 = arith.constant 0 : index
    %c0_37 = arith.constant 0 : index
    %79 = vector.load %arg4[%c0_36, %c0_37] : memref<8x256xf32, #tpu.memory_space<vmem>>, vector<8x256xf32>
    tpu.vector_store %arg4[%c0_36, %c0_37], %78 {strides = array<i32>} : memref<8x256xf32, #tpu.memory_space<vmem>>, vector<8x256xf32>,
    return
  }
  func.func @transform_0(%arg0: i32) -> (i32, i32) {
    %c0_i32 = arith.constant 0 : i32
    %c0_i32_0 = arith.constant 0 : i32
    return %arg0, %c0_i32 : i32, i32
  }
  func.func @transform_1(%arg0: i32) -> (i32, i32) {
    %c0_i32 = arith.constant 0 : i32
    %c0_i32_0 = arith.constant 0 : i32
    %c0_i32_1 = arith.constant 0 : i32
    return %c0_i32, %c0_i32_0 : i32, i32
  }
  func.func @transform_2(%arg0: i32) -> (i32, i32) {
    %c0_i32 = arith.constant 0 : i32
    %c0_i32_0 = arith.constant 0 : i32
    %c0_i32_1 = arith.constant 0 : i32
    return %c0_i32, %c0_i32_0 : i32, i32
  }
  func.func @transform_3(%arg0: i32) -> (i32, i32) {
    %c0_i32 = arith.constant 0 : i32
    %c0_i32_0 = arith.constant 0 : i32
    return %arg0, %c0_i32 : i32, i32
  }
}

</mosaic_0001>

<bundles_post_ra>
// kernel: tile.8
= control target key start
LH: loop header
LB: loop body
LE: loop exit
PB: predicated region body
PF: predicated region fallthrough
CT: control target
= control target key end

     0   :  { %s22_s0 = inlined_call_operand.vmem [shape: f32[4], index: 0, kind: input, shape index: {}]   ;;  %s23_s1 = inlined_call_operand.vmem [shape: f32[2,4], index: 1, kind: output, shape index: {}]  }
   0x1   :  { %v4_v0 = vld [vmem:[%s22_s0] ss:$0 sm:$0xff] }
   0x2   :  { %5 = vst [vmem:[%s23_s1] sm:$0x3] %v4_v0 }

// kernel: tile.0
= control target key start
LH: loop header
LB: loop body
LE: loop exit
PB: predicated region body
PF: predicated region fallthrough
CT: control target
= control target key end

     0   :  { %s34_s8 = smov 125   ;;  %s35_s9 = smov 126   ;;  %vm7_vm0 = vcmask 7168   ;;  %s61_s0 = inlined_call_operand.vmem [shape: f32[2,4], index: 0, kind: input, shape index: {}]   ;;  %s62_s1 = inlined_call_operand.vmem [shape: f32[8,1], index: 1, kind: output, shape index: {}]  }
   0x1   :  { %v4_v0 = vld [vmem:[%s61_s0] sm:$0x3]  ;;  %s33_s0 = smov 127  }
   0x2   :  { %5 = vst [vmem:[#allocation0] sm:$0x3] %v4_v0 }
   0x9   :  { %v9_v1 = vld [vmem:[#allocation0] sm:$0x3]  }
   0xa   :  { %v21_v2 = vld [vmem:[#allocation0] sm:$0x3]   ;;  %10 = vrot.lane.b32.xlu0 %v9_v1, %s33_s0 }
   0xb   :  { %22 = vrot.lane.b32.xlu1 %v21_v2, %s34_s8  ;;  %v15_v3 = vld [vmem:[#allocation0] sm:$0x3]  }
   0xc   :  { %v6_v4 = vld [vmem:[#allocation0] sm:$0x3]  }
   0xd   :  { %8 = vst.msk [vmem:[%s62_s1] ss:$4 sm:$0x3] %vm7_vm0, %v6_v4  }
  0x12   :  { %16 = vrot.lane.b32.xlu0 %v15_v3, %s35_s9 }
  0x7c   :  { %v11_v5 = vpop.permute.xlu0 %10  }
  0x7d   :  { %v23_v6 = vpop.permute.xlu1 %22   ;;  %27 = vst.msk [vmem:[%s62_s1 + $0x1] ss:$4 sm:$0x3] %vm7_vm0, %v11_v5  }
  0x7e   :  { %29 = vst.msk [vmem:[%s62_s1 + $0x3] ss:$4 sm:$0x3] %vm7_vm0, %v23_v6  }
  0x84   :  { %v17_v7 = vpop.permute.xlu0 %16  }
  0x85   :  { %28 = vst.msk [vmem:[%s62_s1 + $0x2] ss:$4 sm:$0x3] %vm7_vm0, %v17_v7  }

// kernel: circular_conv_transpose2d.1
= control target key start
LH: loop header
LB: loop body
LE: loop exit
PB: predicated region body
PF: predicated region fallthrough
CT: control target
= control target key end

     0   :  { %s641_s16 = smov 16   ;;  %s642_s17 = smov 1   ;;  %v16_v5 = vlaneseq  ;;  %vm72_vm5 = vcmask 64512   ;;  %v658_v45 = vmov 0   ;;  %s797_s0 = inlined_call_operand.vmem [shape: f32[8,256], index: 0, kind: input, shape index: {}]   ;;  %s798_s1 = inlined_call_operand.vmem [shape: f32[8,72], index: 1, kind: input, shape index: {}]   ;;  %s799_s2 = inlined_call_operand.vmem [shape: f32[8,1], index: 2, kind: input, shape index: {}]   ;;  %s800_s3 = inlined_call_operand.vmem [shape: f32[8,256], index: 3, kind: output, shape index: {}]  }
   0x1   :  { %v682_v0 = vld [vmem:[%s797_s0] sm:$0xff]  ;;  %v687_v1 = vld [vmem:[%s797_s0 + $0x8] sm:$0xff]  ;;  %s643_s18 = smov 15   ;;  %s644_s21 = smov 120   ;;  %640 = vset.pattern.permute.xlu0 %v658_v45 }
   0x2   :  { %v600_v2 = vpack.i.bf16 %v687_v1, %v682_v0  ;;  %v694_v3 = vld [vmem:[%s798_s1] sm:$0xff]  ;;  %s645_s22 = smov 17   ;;  %s646_s0 = smov 31   ;;  %v704_v6 = vand.u32 127, %v16_v5 }
   0x3   :  { %s647_s23 = smov 112   ;;  %s648_s24 = smov 113   ;;  %v540_v43 = vld [vmem:[%s799_s2] sm:$0xff] }
   0x4   :  { %601 = vrot.lane.b32.xlu1 %v600_v2, %s641_s16  ;;  %591 = vrot.lane.b32.xlu0 %v600_v2, %s642_s17  ;;  %s649_s25 = smov 104   ;;  %s650_s26 = smov 96   ;;  %v18_v7 = vadd.s32 128, %v704_v6  ;;  %v23_v9 = vand.u32 15, %v704_v6  ;;  %vm161_vm0 = vcmp.lt.s32.totalorder %v704_v6, 15  ;;  %vm168_vm1 = vcmp.lt.s32.totalorder %v704_v6, 31 }
   0x5   :  { %606 = vrot.lane.b32.xlu2 %v600_v2, %s643_s18  ;;  %s651_s1 = smov 127   ;;  %s652_s27 = smov 88   ;;  %vm66_vm4 = vcmp.lt.s32.totalorder %v704_v6, 16  ;;  %vm47_vm6 = vcmp.lt.s32.totalorder %v704_v6, 1  ;;  %vm54_vm7 = vcmp.lt.s32.totalorder %v704_v6, 17  ;;  %vm225_vm10 = vcmp.lt.s32.totalorder %v704_v6, 113 }
   0x6   :  { %s653_s28 = smov 97   ;;  %s654_s29 = smov 80   ;;  %v30_v10 = vand.u32 15, %v18_v7  ;;  %vm710_vm2 = vcmp.lt.s32.totalorder %v23_v9, 15  ;;  %vm733_vm8 = vcmp.lt.s32.totalorder %v23_v9, 1  ;;  %vm326_vm11 = vcmp.lt.s32.totalorder %v704_v6, 127 }
   0x7   :  { %s655_s30 = smov 111   ;;  %s656_s4 = smov 72   ;;  %vm436_vm12 = vcmp.lt.s32.totalorder %v704_v6, 112  ;;  %vm381_vm13 = vcmp.lt.s32.totalorder %v704_v6, 97  ;;  %vm489_vm14 = vcmp.lt.s32.totalorder %v704_v6, 111 }
   0x8   :  { %s657_s5 = smov 64   ;;  %vm714_vm3 = vcmp.lt.s32.totalorder %v30_v10, 15  ;;  %vm737_vm9 = vcmp.lt.s32.totalorder %v30_v10, 1 }
   0xc   :  { %70 = vrot.lane.b32.xlu1 %v694_v3, %s644_s21  ;;  %596 = vrot.lane.b32.xlu0 %v600_v2, %s645_s22 }
   0xd   :  { %611 = vrot.lane.b32.xlu2 %v600_v2, %s646_s0 }
  0x14   :  { %175 = vrot.lane.b32.xlu1 %v694_v3, %s647_s23  ;;  %616 = vrot.lane.b32.xlu0 %v600_v2, %s648_s24 }
  0x15   :  { %230 = vrot.lane.b32.xlu2 %v694_v3, %s649_s25 }
  0x1c   :  { %276 = vrot.lane.b32.xlu1 %v694_v3, %s650_s26  ;;  %621 = vrot.lane.b32.xlu0 %v600_v2, %s651_s1 }
  0x1d   :  { %331 = vrot.lane.b32.xlu2 %v694_v3, %s652_s27 }
  0x24   :  { %631 = vrot.lane.b32.xlu1 %v600_v2, %s647_s23  ;;  %626 = vrot.lane.b32.xlu0 %v600_v2, %s653_s28 }
  0x25   :  { %386 = vrot.lane.b32.xlu2 %v694_v3, %s654_s29 }
  0x2c   :  { %636 = vrot.lane.b32.xlu1 %v600_v2, %s655_s30  ;;  %439 = vrot.lane.b32.xlu0 %v694_v3, %s656_s4 }
  0x2d   :  { %494 = vrot.lane.b32.xlu2 %v694_v3, %s657_s5 }
  0x34   :  { %543 = vperm.xlu0 %640, %v540_v43  }
  0x5f   :  { %v607_v4 = vpop.permute.xlu2 %606 }
  0x60   :  { %v609_v11 = vunpack.i.h.bf16 %v607_v4  ;;  %v608_v12 = vunpack.i.l.bf16 %v607_v4 }
  0x62   :  { %v718_v17 = vsel %vm161_vm0, %v609_v11, %v608_v12  ;;  %v720_v19 = vsel %vm161_vm0, %v608_v12, %v609_v11 }
  0x67   :  { %v612_v8 = vpop.permute.xlu2 %611 }
  0x68   :  { %v614_v13 = vunpack.i.h.bf16 %v612_v8  ;;  %v613_v14 = vunpack.i.l.bf16 %v612_v8 }
  0x6a   :  { %v170_v18 = vsel %vm168_vm1, %v614_v13, %v613_v14  ;;  %v169_v20 = vsel %vm168_vm1, %v613_v14, %v614_v13 }
  0x6b   :  { %v173_v25 = vsel %vm710_vm2, %v718_v17, %v170_v18  ;;  %v174_v26 = vsel %vm714_vm3, %v720_v19, %v169_v20 }
  0x6f   :  { %v231_v44 = vpop.permute.xlu2 %230 }
  0x76   :  { %v602_v21 = vpop.permute.xlu1 %601  ;;  %v592_v22 = vpop.permute.xlu0 %591 }
  0x77   :  { %v604_v23 = vunpack.i.h.bf16 %v602_v21  ;;  %v603_v24 = vunpack.i.l.bf16 %v602_v21  ;;  %v594_v29 = vunpack.i.h.bf16 %v592_v22  ;;  %v593_v30 = vunpack.i.l.bf16 %v592_v22  ;;  %v332_v58 = vpop.permute.xlu2 %331 }
  0x79   :  { %v68_v27 = vsel %vm66_vm4, %v604_v23, %v603_v24  ;;  %v67_v28 = vsel %vm66_vm4, %v603_v24, %v604_v23  ;;  %v49_v37 = vsel %vm47_vm6, %v594_v29, %v593_v30  ;;  %v48_v39 = vsel %vm47_vm6, %v593_v30, %v594_v29 }
  0x7a   :  { %90 = vmatpush.msra.mxu0 %v68_v27  ;;  %110 = vmatpush.msra.mxu1 %v67_v28 }
  0x7c   :  { %194 = vmatpush.msrb.mxu0 %v173_v25  ;;  %214 = vmatpush.msrb.mxu1 %v174_v26 }
  0x7e   :  { %v71_v31 = vpop.permute.xlu1 %70  ;;  %v597_v32 = vpop.permute.xlu0 %596 }
  0x7f   :  { %v599_v33 = vunpack.i.h.bf16 %v597_v32  ;;  %v598_v34 = vunpack.i.l.bf16 %v597_v32  ;;  %554 = vmatmul.msk.f32.vlgmr.msra.gmra.mxu0 %vm72_vm5, %v71_v31  ;;  %555 = vmatmul.msk.f32.vlgmr.msra.gmra.mxu1 %vm72_vm5, %v71_v31  ;;  %v387_v8 = vpop.permute.xlu2 %386 }
  0x80   :  { %295 = vmatpush.msra.mxu0 %v682_v0  ;;  %315 = vmatpush.msra.mxu1 %v687_v1 }
  0x81   :  { %v56_v38 = vsel %vm54_vm7, %v599_v33, %v598_v34  ;;  %v55_v40 = vsel %vm54_vm7, %v598_v34, %v599_v33 }
  0x82   :  { %v59_v41 = vsel %vm733_vm8, %v49_v37, %v56_v38  ;;  %v60_v42 = vsel %vm737_vm9, %v48_v39, %v55_v40 }
  0x83   :  { %132 = vmatpush.msra.mxu2 %v59_v41  ;;  %152 = vmatpush.msra.mxu3 %v60_v42 }
  0x84   :  { %556 = vmatmul.msk.f32.vlgmr.msra.gmra.mxu2 %vm72_vm5, %v694_v3  ;;  %557 = vmatmul.msk.f32.vlgmr.msra.gmra.mxu3 %vm72_vm5, %v694_v3 }
  0x86   :  { %v176_v46 = vpop.permute.xlu1 %175  ;;  %v617_v47 = vpop.permute.xlu0 %616 }
  0x87   :  { %v619_v48 = vunpack.i.h.bf16 %v617_v47  ;;  %v618_v49 = vunpack.i.l.bf16 %v617_v47  ;;  %558 = vmatmul.msk.f32.vlgmr.msrb.gmra.mxu0 %vm72_vm5, %v176_v46  ;;  %559 = vmatmul.msk.f32.vlgmr.msrb.gmra.mxu1 %vm72_vm5, %v176_v46  ;;  %v495_v21 = vpop.permute.xlu2 %494 }
  0x89   :  { %v226_v50 = vsel %vm225_vm10, %v618_v49, %v619_v48  ;;  %v227_v51 = vsel %vm225_vm10, %v619_v48, %v618_v49 }
  0x8a   :  { %v228_v52 = vsel %vm733_vm8, %v226_v50, %v49_v37  ;;  %v229_v53 = vsel %vm737_vm9, %v227_v51, %v48_v39 }
  0x8b   :  { %249 = vmatpush.msrb.mxu2 %v228_v52  ;;  %269 = vmatpush.msrb.mxu3 %v229_v53 }
  0x8c   :  { %560 = vmatmul.msk.f32.vlgmr.msrb.gmra.mxu2 %vm72_vm5, %v231_v44  ;;  %561 = vmatmul.msk.f32.vlgmr.msrb.gmra.mxu3 %vm72_vm5, %v231_v44 }
  0x8e   :  { %v277_v54 = vpop.permute.xlu1 %276  ;;  %v622_v55 = vpop.permute.xlu0 %621 }
  0x8f   :  { %v624_v56 = vunpack.i.h.bf16 %v622_v55  ;;  %v623_v57 = vunpack.i.l.bf16 %v622_v55  ;;  %562 = vmatmul.msk.f32.vlgmr.msra.gmra.mxu0 %vm72_vm5, %v277_v54  ;;  %563 = vmatmul.msk.f32.vlgmr.msra.gmra.mxu1 %vm72_vm5, %v277_v54 }
  0x91   :  { %v327_v59 = vsel %vm326_vm11, %v623_v57, %v624_v56  ;;  %v328_v60 = vsel %vm326_vm11, %v624_v56, %v623_v57 }
  0x92   :  { %v329_v61 = vsel %vm710_vm2, %v327_v59, %v718_v17  ;;  %v330_v62 = vsel %vm714_vm3, %v328_v60, %v720_v19 }
  0x93   :  { %350 = vmatpush.msra.mxu2 %v329_v61  ;;  %370 = vmatpush.msra.mxu3 %v330_v62 }
  0x94   :  { %564 = vmatmul.msk.f32.vlgmr.msra.gmra.mxu2 %vm72_vm5, %v332_v58  ;;  %565 = vmatmul.msk.f32.vlgmr.msra.gmra.mxu3 %vm72_vm5, %v332_v58 }
  0x96   :  { %v632_v63 = vpop.permute.xlu1 %631  ;;  %v627_v0 = vpop.permute.xlu0 %626 }
  0x97   :  { %v634_v1 = vunpack.i.h.bf16 %v632_v63  ;;  %v633_v2 = vunpack.i.l.bf16 %v632_v63  ;;  %v629_v3 = vunpack.i.h.bf16 %v627_v0  ;;  %v628_v4 = vunpack.i.l.bf16 %v627_v0 }
  0x99   :  { %v437_v5 = vsel %vm436_vm12, %v633_v2, %v634_v1  ;;  %v438_v7 = vsel %vm436_vm12, %v634_v1, %v633_v2  ;;  %v382_v9 = vsel %vm381_vm13, %v628_v4, %v629_v3  ;;  %v383_v10 = vsel %vm381_vm13, %v629_v3, %v628_v4 }
  0x9a   :  { %458 = vmatpush.msrb.mxu2 %v437_v5  ;;  %478 = vmatpush.msrb.mxu3 %v438_v7  ;;  %v384_v11 = vsel %vm733_vm8, %v382_v9, %v226_v50  ;;  %v385_v12 = vsel %vm737_vm9, %v383_v10, %v227_v51 }
  0x9b   :  { %405 = vmatpush.msrb.mxu0 %v384_v11  ;;  %425 = vmatpush.msrb.mxu1 %v385_v12 }
  0x9c   :  { %566 = vmatmul.msk.f32.vlgmr.msrb.gmra.mxu0 %vm72_vm5, %v387_v8  ;;  %567 = vmatmul.msk.f32.vlgmr.msrb.gmra.mxu1 %vm72_vm5, %v387_v8 }
  0x9e   :  { %v637_v13 = vpop.permute.xlu1 %636  ;;  %v440_v14 = vpop.permute.xlu0 %439 }
  0x9f   :  { %v639_v17 = vunpack.i.h.bf16 %v637_v13  ;;  %v638_v18 = vunpack.i.l.bf16 %v637_v13  ;;  %568 = vmatmul.msk.f32.vlgmr.msrb.gmra.mxu2 %vm72_vm5, %v440_v14  ;;  %569 = vmatmul.msk.f32.vlgmr.msrb.gmra.mxu3 %vm72_vm5, %v440_v14 }
  0xa1   :  { %v490_v19 = vsel %vm489_vm14, %v638_v18, %v639_v17  ;;  %v491_v20 = vsel %vm489_vm14, %v639_v17, %v638_v18 }
  0xa2   :  { %v492_v22 = vsel %vm710_vm2, %v490_v19, %v327_v59  ;;  %v493_v23 = vsel %vm714_vm3, %v491_v20, %v328_v60 }
  0xa3   :  { %513 = vmatpush.msra.mxu0 %v492_v22  ;;  %533 = vmatpush.msra.mxu1 %v493_v23 }
  0xa4   :  { %570 = vmatmul.msk.f32.vlgmr.msra.gmra.mxu0 %vm72_vm5, %v495_v21  ;;  %571 = vmatmul.msk.f32.vlgmr.msra.gmra.mxu1 %vm72_vm5, %v495_v21 }
  0xa6   :  { %v544_v53 = vpop.permute.xlu0 %543 }
  0xfc   :  { %v92_v6 = vpop.f32.mrf.mxu0  ;;  %v112_v24 = vpop.f32.mrf.mxu1 }
 0x104   :  { %v196_v25 = vpop.f32.mrf.mxu0  ;;  %v216_v26 = vpop.f32.mrf.mxu1 }
 0x107   :  { %v134_v27 = vpop.f32.mrf.mxu2  ;;  %v154_v28 = vpop.f32.mrf.mxu3 }
 0x108   :  { %v135_v31 = vadd.f32 %v134_v27, %v92_v6  ;;  %v155_v15 = vadd.f32 %v154_v28, %v112_v24 }
 0x10a   :  { %v219_v16 = vadd.f32 %v196_v25, %v135_v31  ;;  %v220_v34 = vadd.f32 %v216_v26, %v155_v15 }
 0x10c   :  { %v297_v32 = vpop.f32.mrf.mxu0  ;;  %v317_v33 = vpop.f32.mrf.mxu1 }
 0x10f   :  { %v251_v29 = vpop.f32.mrf.mxu2  ;;  %v271_v30 = vpop.f32.mrf.mxu3 }
 0x110   :  { %v274_v35 = vadd.f32 %v251_v29, %v219_v16  ;;  %v275_v36 = vadd.f32 %v271_v30, %v220_v34 }
 0x112   :  { %v320_v41 = vadd.f32 %v297_v32, %v274_v35  ;;  %v321_v42 = vadd.f32 %v317_v33, %v275_v36 }
 0x117   :  { %v352_v39 = vpop.f32.mrf.mxu2  ;;  %v372_v40 = vpop.f32.mrf.mxu3 }
 0x118   :  { %v375_v43 = vadd.f32 %v352_v39, %v320_v41  ;;  %v376_v44 = vadd.f32 %v372_v40, %v321_v42 }
 0x119   :  { %v407_v37 = vpop.f32.mrf.mxu0  ;;  %v427_v38 = vpop.f32.mrf.mxu1 }
 0x11a   :  { %v430_v45 = vadd.f32 %v407_v37, %v375_v43  ;;  %v431_v46 = vadd.f32 %v427_v38, %v376_v44 }
 0x121   :  { %v515_v47 = vpop.f32.mrf.mxu0  ;;  %v535_v48 = vpop.f32.mrf.mxu1 }
 0x122   :  { %v460_v49 = vpop.f32.mrf.mxu2  ;;  %v480_v50 = vpop.f32.mrf.mxu3 }
 0x123   :  { %v483_v51 = vadd.f32 %v460_v49, %v430_v45  ;;  %v484_v52 = vadd.f32 %v480_v50, %v431_v46 }
 0x125   :  { %v538_v54 = vadd.f32 %v515_v47, %v483_v51  ;;  %v539_v55 = vadd.f32 %v535_v48, %v484_v52 }
 0x127   :  { %v546_v56 = vadd.f32 %v544_v53, %v538_v54  ;;  %v547_v57 = vadd.f32 %v544_v53, %v539_v55 }
 0x129   :  { %548 = vst [vmem:[%s800_s3] sm:$0xff] %v546_v56 }
 0x12a   :  { %549 = vst [vmem:[%s800_s3 + $0x8] sm:$0xff] %v547_v57 }

</bundles_post_ra>
